<compile_context>
chip_gen: v7x
topology: tpu7x:2x2x1
jax: 0.10.0
libtpu: 0.0.40
codegen_flags: <defaults>
</compile_context>

<pallas_src>
import functools
from typing import NamedTuple

import jax
import jax.numpy as jnp
from jax.experimental import pallas as pl
from jax.experimental.pallas import tpu as pltpu

LANE = 128
SUBLANE = 8


def _round_up(x, m):
    return ((x + m - 1) // m) * m


class PolicyConfig(NamedTuple):
    in_dim: int
    out_dim: int
    in_pad: int
    hpad: int
    out_pad: int
    num_mid: int
    has_last: bool


# ----------------------------------------------------------------------------
# Kernel
# ----------------------------------------------------------------------------
def _policy_mlp_kernel(*refs, num_mid, has_last, out_dim):
    """Refs (in order): x[tm,in_pad], wf[in_pad,hpad], bf[1,hpad],
    (wm[num_mid,hpad,hpad], bm[num_mid,1,hpad] if num_mid>0),
    (wl[hpad,out_pad], bl[1,out_pad] if has_last), out[tm,out_pad]."""
    refs = list(refs)
    x_ref = refs.pop(0)
    wf_ref = refs.pop(0)
    bf_ref = refs.pop(0)
    wm_ref = bm_ref = wl_ref = bl_ref = None
    if num_mid > 0:
        wm_ref = refs.pop(0)
        bm_ref = refs.pop(0)
    if has_last:
        wl_ref = refs.pop(0)
        bl_ref = refs.pop(0)
    out_ref = refs.pop(0)

    # First layer: bf16 operands, f32 accumulation on the MXU.
    h = jnp.dot(x_ref[...].astype(jnp.bfloat16), wf_ref[...],
                preferred_element_type=jnp.float32) + bf_ref[...]

    if has_last:
        h = jnp.maximum(h, 0.0)  # first layer is a hidden block -> ReLU
        for layer in range(num_mid):
            h = jnp.dot(h.astype(jnp.bfloat16), wm_ref[layer],
                        preferred_element_type=jnp.float32) + bm_ref[layer]
            h = jnp.maximum(h, 0.0)
        # Final Linear (no ReLU), produces only out_pad lanes.
        h = jnp.dot(h.astype(jnp.bfloat16), wl_ref[...],
                    preferred_element_type=jnp.float32) + bl_ref[...]

    # Softmax over the action axis (dim=1). Padded lanes (>= out_dim) carry
    # zero logits from the zero-padded weights -> mask them out of the softmax.
    lane_id = jax.lax.broadcasted_iota(jnp.int32, h.shape, dimension=1)
    logits = jnp.where(lane_id < out_dim, h, -1e30)
    m = jnp.max(logits, axis=1, keepdims=True)
    e = jnp.exp(logits - m)
    denom = jnp.sum(e, axis=1, keepdims=True)          # >= 1.0 (max subtracted)
    r = pl.reciprocal(denom, approx=True)              # EUP vrcp (free slot)
    r = r * (2.0 - denom * r)                          # one Newton step -> ~f32 accurate
    out_ref[...] = (e * r).astype(out_ref.dtype)


# ----------------------------------------------------------------------------
# One-time parameter packing (NOT on the per-call path)
# ----------------------------------------------------------------------------
def pack_params(params):
    """params: list of (W [fan_in, fan_out] f32, b [fan_out] f32). Packs once
    into lane-padded bf16 weights / f32 biases and returns (packed, cfg)."""
    num_layers = len(params)
    in_dim = params[0][0].shape[0]
    out_dim = params[-1][0].shape[1]
    has_last = num_layers >= 2
    num_mid = max(num_layers - 2, 0)

    in_pad = _round_up(in_dim, LANE)
    out_pad = _round_up(out_dim, LANE)
    if has_last:
        maxh = max(w.shape[1] for w, _ in params[:-1])
        # 256-align hidden widths > 128 so the v6e 2x(256x256) MXU is not
        # driven with half-empty passes.
        hpad = _round_up(maxh, 256) if maxh > LANE else LANE
    else:
        hpad = out_pad  # single Linear: first layer *is* the output layer

    def pad_w(w, rows, cols):
        buf = jnp.zeros((rows, cols), jnp.bfloat16)
        return buf.at[: w.shape[0], : w.shape[1]].set(w.astype(jnp.bfloat16))

    def pad_b(b, cols):
        buf = jnp.zeros((1, cols), jnp.float32)
        return buf.at[0, : b.shape[0]].set(b.astype(jnp.float32))

    packed = {
        "wf": pad_w(params[0][0], in_pad, hpad),
        "bf": pad_b(params[0][1], hpad),
    }
    if num_mid > 0:
        wm = jnp.zeros((num_mid, hpad, hpad), jnp.bfloat16)
        bm = jnp.zeros((num_mid, 1, hpad), jnp.float32)
        for i, (w, b) in enumerate(params[1:-1]):
            wm = wm.at[i, : w.shape[0], : w.shape[1]].set(w.astype(jnp.bfloat16))
            bm = bm.at[i, 0, : b.shape[0]].set(b.astype(jnp.float32))
        packed["wm"] = wm
        packed["bm"] = bm
    if has_last:
        packed["wl"] = pad_w(params[-1][0], hpad, out_pad)
        packed["bl"] = pad_b(params[-1][1], out_pad)

    cfg = PolicyConfig(in_dim=in_dim, out_dim=out_dim, in_pad=in_pad, hpad=hpad,
                       out_pad=out_pad, num_mid=num_mid, has_last=has_last)
    return packed, cfg


# ----------------------------------------------------------------------------
# Forward wrapper
# ----------------------------------------------------------------------------
@functools.partial(
    jax.jit, static_argnames=("cfg", "batch_tile", "single_buffer_weights"))
def _forward_impl(x, packed, *, cfg, batch_tile, single_buffer_weights):
    batch = x.shape[0]
    tm = min(batch_tile, _round_up(batch, SUBLANE))
    batch_pad = _round_up(batch, tm)

    x_pad = jnp.zeros((batch_pad, cfg.in_pad), jnp.float32)
    x_pad = x_pad.at[:batch, :cfg.in_dim].set(x.astype(jnp.float32))

    # Constant-index (VMEM-resident) blocks: single-buffer them if requested.
    weight_kwargs = (
        {"pipeline_mode": pl.Buffered(1)} if single_buffer_weights else {})

    def const_spec(shape):
        imap = (lambda i: (0, 0)) if len(shape) == 2 else (lambda i: (0, 0, 0))
        return pl.BlockSpec(shape, imap, **weight_kwargs)

    operands = [x_pad, packed["wf"], packed["bf"]]
    in_specs = [
        pl.BlockSpec((tm, cfg.in_pad), lambda i: (i, 0)),
        const_spec((cfg.in_pad, cfg.hpad)),
        const_spec((1, cfg.hpad)),
    ]
    if cfg.num_mid > 0:
        operands += [packed["wm"], packed["bm"]]
        in_specs += [
            const_spec((cfg.num_mid, cfg.hpad, cfg.hpad)),
            const_spec((cfg.num_mid, 1, cfg.hpad)),
        ]
    if cfg.has_last:
        operands += [packed["wl"], packed["bl"]]
        in_specs += [
            const_spec((cfg.hpad, cfg.out_pad)),
            const_spec((1, cfg.out_pad)),
        ]

    # Explicit VMEM budget (bytes): double-buffered x/out tiles, weights at the
    # chosen buffering, plus activation headroom.  Capped at 48 MiB for v7x.
    wmul = 1 if single_buffer_weights else 2
    w_elems = (cfg.in_pad * cfg.hpad
               + cfg.num_mid * cfg.hpad * cfg.hpad
               + (cfg.hpad * cfg.out_pad if cfg.has_last else 0))
    b_elems = (cfg.hpad + cfg.num_mid * cfg.hpad
               + (cfg.out_pad if cfg.has_last else 0))
    est = (2 * tm * cfg.in_pad * 4            # x tile, double-buffered
           + 2 * tm * cfg.out_pad * 4         # out tile, double-buffered
           + wmul * (w_elems * 2 + b_elems * 4)
           + 4 * tm * max(cfg.hpad, cfg.out_pad) * 4)  # activation scratch headroom
    vmem_limit = int(min(max(2 * est, 16 * 1024 * 1024), 48 * 1024 * 1024))

    kernel = functools.partial(_policy_mlp_kernel, num_mid=cfg.num_mid,
                               has_last=cfg.has_last, out_dim=cfg.out_dim)

    probs_padded = pl.pallas_call(
        kernel,
        out_shape=jax.ShapeDtypeStruct((batch_pad, cfg.out_pad), jnp.float32),
        grid=(batch_pad // tm,),
        in_specs=in_specs,
        out_specs=pl.BlockSpec((tm, cfg.out_pad), lambda i: (i, 0)),
        compiler_params=pltpu.CompilerParams(
            dimension_semantics=("parallel",),
            vmem_limit_bytes=vmem_limit,
        ),
    )(*operands)

    return probs_padded[:batch, :cfg.out_dim]


def policy_estimator_forward(x, packed, cfg, *, batch_tile=512):
    """PolicyEstimator.forward: softmax(MLP(x), dim=1).  x: [batch, in_dim]."""
    try:
        out = _forward_impl(x, packed, cfg=cfg, batch_tile=batch_tile,
                            single_buffer_weights=True)
        jax.block_until_ready(out)
        return out
    except Exception:
        # pl.Buffered(1) single-buffering not supported by this jax/libtpu
        # build -> fall back to default double-buffered weight blocks.
        return _forward_impl(x, packed, cfg=cfg, batch_tile=batch_tile,
                             single_buffer_weights=False)


# ----------------------------------------------------------------------------
# Parameter init matching nn.Linear defaults for [in] + hidden + [out]
# ----------------------------------------------------------------------------
def init_params(key, in_dim, out_dim, hidden_layers):
    arch = [in_dim] + list(hidden_layers) + [out_dim]
    params = []
    for fan_in, fan_out in zip(arch[:-1], arch[1:]):
        key, kw, kb = jax.random.split(key, 3)
        bound = 1.0 / jnp.sqrt(jnp.float32(fan_in))
        w = jax.random.uniform(kw, (fan_in, fan_out), jnp.float32, -bound, bound)
        b = jax.random.uniform(kb, (fan_out,), jnp.float32, -bound, bound)
        params.append((w, b))
    return params


if __name__ == "__main__":
    # Small shapes consistent with PolicyEstimator(in_dim, out_dim, hiddenLayers)
    batch = 4
    in_dim = 8
    out_dim = 4
    hidden_layers = [32, 32]

    key = jax.random.PRNGKey(0)
    key, kx = jax.random.split(key)
    x = jax.random.normal(kx, (batch, in_dim), jnp.float32)

    params = init_params(key, in_dim, out_dim, hidden_layers)
    packed, cfg = pack_params(params)          # one-time packing (off hot path)

    probs = policy_estimator_forward(x, packed, cfg)
    probs = jax.block_until_ready(probs)

    # Pure-JAX f32 reference of the same forward (loose tol: kernel uses bf16 weights).
    h = x
    for i, (w, b) in enumerate(params):
        h = h @ w + b
        if i < len(params) - 1:
            h = jnp.maximum(h, 0.0)
    ref_f32 = jax.nn.softmax(h, axis=1)

    # bf16-matched reference (same precision recipe as the kernel) for a tight check.
    h = x
    for i, (w, b) in enumerate(params):
        h = jnp.dot(h.astype(jnp.bfloat16), w.astype(jnp.bfloat16),
                    preferred_element_type=jnp.float32) + b
        if i < len(params) - 1:
            h = jnp.maximum(h, 0.0)
    ref_bf16 = jax.nn.softmax(h, axis=1)

    assert probs.shape == (batch, out_dim)
    assert jnp.allclose(jnp.sum(probs, axis=1), 1.0, atol=1e-3)
    assert jnp.allclose(probs, ref_f32, atol=2e-2, rtol=2e-2)
    assert jnp.allclose(probs, ref_bf16, atol=5e-3, rtol=5e-3)

    print("KERNEL_OK")
</pallas_src>

<mosaic_0001>
module attributes {stable_mosaic.version = 11 : i64} {
  func.func @_policy_mlp_kernel(%arg0: i32, %arg1: memref<8x128xf32, #tpu.memory_space<vmem>>, %arg2: memref<128x128xbf16, #tpu.memory_space<vmem>>, %arg3: memref<1x128xf32, #tpu.memory_space<vmem>>, %arg4: memref<1x128x128xbf16, #tpu.memory_space<vmem>>, %arg5: memref<1x1x128xf32, #tpu.memory_space<vmem>>, %arg6: memref<128x128xbf16, #tpu.memory_space<vmem>>, %arg7: memref<1x128xf32, #tpu.memory_space<vmem>>, %arg8: memref<8x128xf32, #tpu.memory_space<vmem>>) attributes {dimension_semantics = [#tpu.dimension_semantics<parallel>], iteration_bounds = array<i64: 1>, scalar_prefetch = 0 : i64, scratch_operands = 0 : i64, tpu.core_type = #tpu.core_type<tc>, window_params = [{transform_indices = @transform_0, window_bounds = array<i64: 8, 128>}, {pipeline_mode = #tpu.pipeline_mode<synchronous>, transform_indices = @transform_1, window_bounds = array<i64: 128, 128>}, {pipeline_mode = #tpu.pipeline_mode<synchronous>, transform_indices = @transform_2, window_bounds = array<i64: 1, 128>}, {pipeline_mode = #tpu.pipeline_mode<synchronous>, transform_indices = @transform_3, window_bounds = array<i64: 1, 128, 128>}, {pipeline_mode = #tpu.pipeline_mode<synchronous>, transform_indices = @transform_4, window_bounds = array<i64: 1, 1, 128>}, {pipeline_mode = #tpu.pipeline_mode<synchronous>, transform_indices = @transform_5, window_bounds = array<i64: 128, 128>}, {pipeline_mode = #tpu.pipeline_mode<synchronous>, transform_indices = @transform_6, window_bounds = array<i64: 1, 128>}, {transform_indices = @transform_7, window_bounds = array<i64: 8, 128>}]} {
    %c0 = arith.constant 0 : index
    %c0_0 = arith.constant 0 : index
    %0 = vector.load %arg1[%c0, %c0_0] : memref<8x128xf32, #tpu.memory_space<vmem>>, vector<8x128xf32>
    %1 = arith.truncf %0 : vector<8x128xf32> to vector<8x128xbf16>
    %c0_1 = arith.constant 0 : index
    %c0_2 = arith.constant 0 : index
    %2 = vector.load %arg2[%c0_1, %c0_2] : memref<128x128xbf16, #tpu.memory_space<vmem>>, vector<128x128xbf16>
    %cst = arith.constant dense<0.000000e+00> : vector<8x128xf32>
    %3 = tpu.matmul %1, %2, %cst {dimension_numbers = #tpu.dot_dimension_numbers<[1], [0], [0], [1], [0, 0, 1, 1], [], []>} : vector<8x128xbf16>, vector<128x128xbf16>, vector<8x128xf32> -> vector<8x128xf32>
    %c0_3 = arith.constant 0 : index
    %c0_4 = arith.constant 0 : index
    %4 = vector.load %arg3[%c0_3, %c0_4] : memref<1x128xf32, #tpu.memory_space<vmem>>, vector<1x128xf32>
    %5 = vector.broadcast %4 : vector<1x128xf32> to vector<8x128xf32>
    %6 = arith.addf %3, %5 : vector<8x128xf32>
    %cst_5 = arith.constant 0.000000e+00 : f32
    %7 = vector.broadcast %cst_5 : f32 to vector<8x128xf32>
    %8 = arith.maximumf %6, %7 : vector<8x128xf32>
    %9 = arith.truncf %8 : vector<8x128xf32> to vector<8x128xbf16>
    %c0_6 = arith.constant 0 : index
    %c0_7 = arith.constant 0 : index
    %c0_8 = arith.constant 0 : index
    %10 = vector.load %arg4[%c0_6, %c0_7, %c0_8] : memref<1x128x128xbf16, #tpu.memory_space<vmem>>, vector<1x128x128xbf16>
    %11 = vector.shape_cast %10 : vector<1x128x128xbf16> to vector<128x128xbf16>
    %cst_9 = arith.constant dense<0.000000e+00> : vector<8x128xf32>
    %12 = tpu.matmul %9, %11, %cst_9 {dimension_numbers = #tpu.dot_dimension_numbers<[1], [0], [0], [1], [0, 0, 1, 1], [], []>} : vector<8x128xbf16>, vector<128x128xbf16>, vector<8x128xf32> -> vector<8x128xf32>
    %c0_10 = arith.constant 0 : index
    %c0_11 = arith.constant 0 : index
    %c0_12 = arith.constant 0 : index
    %13 = vector.load %arg5[%c0_10, %c0_11, %c0_12] : memref<1x1x128xf32, #tpu.memory_space<vmem>>, vector<1x1x128xf32>
    %14 = vector.shape_cast %13 : vector<1x1x128xf32> to vector<1x128xf32>
    %15 = vector.broadcast %14 : vector<1x128xf32> to vector<8x128xf32>
    %16 = arith.addf %12, %15 : vector<8x128xf32>
    %cst_13 = arith.constant 0.000000e+00 : f32
    %17 = vector.broadcast %cst_13 : f32 to vector<8x128xf32>
    %18 = arith.maximumf %16, %17 : vector<8x128xf32>
    %19 = arith.truncf %18 : vector<8x128xf32> to vector<8x128xbf16>
    %c0_14 = arith.constant 0 : index
    %c0_15 = arith.constant 0 : index
    %20 = vector.load %arg6[%c0_14, %c0_15] : memref<128x128xbf16, #tpu.memory_space<vmem>>, vector<128x128xbf16>
    %cst_16 = arith.constant dense<0.000000e+00> : vector<8x128xf32>
    %21 = tpu.matmul %19, %20, %cst_16 {dimension_numbers = #tpu.dot_dimension_numbers<[1], [0], [0], [1], [0, 0, 1, 1], [], []>} : vector<8x128xbf16>, vector<128x128xbf16>, vector<8x128xf32> -> vector<8x128xf32>
    %c0_17 = arith.constant 0 : index
    %c0_18 = arith.constant 0 : index
    %22 = vector.load %arg7[%c0_17, %c0_18] : memref<1x128xf32, #tpu.memory_space<vmem>>, vector<1x128xf32>
    %23 = vector.broadcast %22 : vector<1x128xf32> to vector<8x128xf32>
    %24 = arith.addf %21, %23 : vector<8x128xf32>
    %25 = tpu.iota {dimensions = array<i32: 1>} : vector<8x128xi32>
    %c4_i32 = arith.constant 4 : i32
    %26 = vector.broadcast %c4_i32 : i32 to vector<8x128xi32>
    %27 = arith.cmpi slt, %25, %26 : vector<8x128xi32>
    %cst_19 = arith.constant -1.000000e+30 : f32
    %28 = vector.broadcast %cst_19 : f32 to vector<8x128xf32>
    %29 = arith.select %27, %24, %28 : vector<8x128xi1>, vector<8x128xf32>
    %cst_20 = arith.constant dense<0xFF800000> : vector<8xf32>
    %30 = vector.multi_reduction <maximumf>, %29, %cst_20 [1] : vector<8x128xf32> to vector<8xf32>
    %31 = vector.shape_cast %30 : vector<8xf32> to vector<8x1xf32>
    %32 = vector.broadcast %31 : vector<8x1xf32> to vector<8x128xf32>
    %33 = arith.subf %29, %32 : vector<8x128xf32>
    %34 = math.exp %33 : vector<8x128xf32>
    %cst_21 = arith.constant dense<0.000000e+00> : vector<8xf32>
    %35 = vector.multi_reduction <add>, %34, %cst_21 [1] : vector<8x128xf32> to vector<8xf32>
    %36 = vector.shape_cast %35 : vector<8xf32> to vector<8x1xf32>
    %37 = tpu.reciprocal %36 {approx = true} : vector<8x1xf32> -> vector<8x1xf32>
    %38 = arith.mulf %36, %37 : vector<8x1xf32>
    %cst_22 = arith.constant 2.000000e+00 : f32
    %39 = vector.broadcast %cst_22 : f32 to vector<8x1xf32>
    %40 = arith.subf %39, %38 : vector<8x1xf32>
    %41 = arith.mulf %37, %40 : vector<8x1xf32>
    %42 = vector.broadcast %41 : vector<8x1xf32> to vector<8x128xf32>
    %43 = arith.mulf %34, %42 : vector<8x128xf32>
    %c0_23 = arith.constant 0 : index
    %c0_24 = arith.constant 0 : index
    %44 = vector.load %arg8[%c0_23, %c0_24] : memref<8x128xf32, #tpu.memory_space<vmem>>, vector<8x128xf32>
    tpu.vector_store %arg8[%c0_23, %c0_24], %43 {strides = array<i32>} : memref<8x128xf32, #tpu.memory_space<vmem>>, vector<8x128xf32>,
    return
  }
  func.func @transform_0(%arg0: i32) -> (i32, i32) {
    %c0_i32 = arith.constant 0 : i32
    %c0_i32_0 = arith.constant 0 : i32
    return %arg0, %c0_i32 : i32, i32
  }
  func.func @transform_1(%arg0: i32) -> (i32, i32) {
    %c0_i32 = arith.constant 0 : i32
    %c0_i32_0 = arith.constant 0 : i32
    %c0_i32_1 = arith.constant 0 : i32
    return %c0_i32, %c0_i32_0 : i32, i32
  }
  func.func @transform_2(%arg0: i32) -> (i32, i32) {
    %c0_i32 = arith.constant 0 : i32
    %c0_i32_0 = arith.constant 0 : i32
    %c0_i32_1 = arith.constant 0 : i32
    return %c0_i32, %c0_i32_0 : i32, i32
  }
  func.func @transform_3(%arg0: i32) -> (i32, i32, i32) {
    %c0_i32 = arith.constant 0 : i32
    %c0_i32_0 = arith.constant 0 : i32
    %c0_i32_1 = arith.constant 0 : i32
    %c0_i32_2 = arith.constant 0 : i32
    return %c0_i32, %c0_i32_0, %c0_i32_1 : i32, i32, i32
  }
  func.func @transform_4(%arg0: i32) -> (i32, i32, i32) {
    %c0_i32 = arith.constant 0 : i32
    %c0_i32_0 = arith.constant 0 : i32
    %c0_i32_1 = arith.constant 0 : i32
    %c0_i32_2 = arith.constant 0 : i32
    return %c0_i32, %c0_i32_0, %c0_i32_1 : i32, i32, i32
  }
  func.func @transform_5(%arg0: i32) -> (i32, i32) {
    %c0_i32 = arith.constant 0 : i32
    %c0_i32_0 = arith.constant 0 : i32
    %c0_i32_1 = arith.constant 0 : i32
    return %c0_i32, %c0_i32_0 : i32, i32
  }
  func.func @transform_6(%arg0: i32) -> (i32, i32) {
    %c0_i32 = arith.constant 0 : i32
    %c0_i32_0 = arith.constant 0 : i32
    %c0_i32_1 = arith.constant 0 : i32
    return %c0_i32, %c0_i32_0 : i32, i32
  }
  func.func @transform_7(%arg0: i32) -> (i32, i32) {
    %c0_i32 = arith.constant 0 : i32
    %c0_i32_0 = arith.constant 0 : i32
    return %arg0, %c0_i32 : i32, i32
  }
}

module attributes {stable_mosaic.version = 11 : i64} {
  func.func @_policy_mlp_kernel(%arg0: i32, %arg1: memref<8x128xf32, #tpu.memory_space<vmem>>, %arg2: memref<128x128xbf16, #tpu.memory_space<vmem>>, %arg3: memref<1x128xf32, #tpu.memory_space<vmem>>, %arg4: memref<1x128x128xbf16, #tpu.memory_space<vmem>>, %arg5: memref<1x1x128xf32, #tpu.memory_space<vmem>>, %arg6: memref<128x128xbf16, #tpu.memory_space<vmem>>, %arg7: memref<1x128xf32, #tpu.memory_space<vmem>>, %arg8: memref<8x128xf32, #tpu.memory_space<vmem>>) attributes {dimension_semantics = [#tpu.dimension_semantics<parallel>], iteration_bounds = array<i64: 1>, scalar_prefetch = 0 : i64, scratch_operands = 0 : i64, tpu.core_type = #tpu.core_type<tc>, window_params = [{transform_indices = @transform_0, window_bounds = array<i64: 8, 128>}, {pipeline_mode = #tpu.pipeline_mode<synchronous>, transform_indices = @transform_1, window_bounds = array<i64: 128, 128>}, {pipeline_mode = #tpu.pipeline_mode<synchronous>, transform_indices = @transform_2, window_bounds = array<i64: 1, 128>}, {pipeline_mode = #tpu.pipeline_mode<synchronous>, transform_indices = @transform_3, window_bounds = array<i64: 1, 128, 128>}, {pipeline_mode = #tpu.pipeline_mode<synchronous>, transform_indices = @transform_4, window_bounds = array<i64: 1, 1, 128>}, {pipeline_mode = #tpu.pipeline_mode<synchronous>, transform_indices = @transform_5, window_bounds = array<i64: 128, 128>}, {pipeline_mode = #tpu.pipeline_mode<synchronous>, transform_indices = @transform_6, window_bounds = array<i64: 1, 128>}, {transform_indices = @transform_7, window_bounds = array<i64: 8, 128>}]} {
    %c0 = arith.constant 0 : index
    %c0_0 = arith.constant 0 : index
    %0 = vector.load %arg1[%c0, %c0_0] : memref<8x128xf32, #tpu.memory_space<vmem>>, vector<8x128xf32>
    %1 = arith.truncf %0 : vector<8x128xf32> to vector<8x128xbf16>
    %c0_1 = arith.constant 0 : index
    %c0_2 = arith.constant 0 : index
    %2 = vector.load %arg2[%c0_1, %c0_2] : memref<128x128xbf16, #tpu.memory_space<vmem>>, vector<128x128xbf16>
    %cst = arith.constant dense<0.000000e+00> : vector<8x128xf32>
    %3 = tpu.matmul %1, %2, %cst {dimension_numbers = #tpu.dot_dimension_numbers<[1], [0], [0], [1], [0, 0, 1, 1], [], []>} : vector<8x128xbf16>, vector<128x128xbf16>, vector<8x128xf32> -> vector<8x128xf32>
    %c0_3 = arith.constant 0 : index
    %c0_4 = arith.constant 0 : index
    %4 = vector.load %arg3[%c0_3, %c0_4] : memref<1x128xf32, #tpu.memory_space<vmem>>, vector<1x128xf32>
    %5 = vector.broadcast %4 : vector<1x128xf32> to vector<8x128xf32>
    %6 = arith.addf %3, %5 : vector<8x128xf32>
    %cst_5 = arith.constant 0.000000e+00 : f32
    %7 = vector.broadcast %cst_5 : f32 to vector<8x128xf32>
    %8 = arith.maximumf %6, %7 : vector<8x128xf32>
    %9 = arith.truncf %8 : vector<8x128xf32> to vector<8x128xbf16>
    %c0_6 = arith.constant 0 : index
    %c0_7 = arith.constant 0 : index
    %c0_8 = arith.constant 0 : index
    %10 = vector.load %arg4[%c0_6, %c0_7, %c0_8] : memref<1x128x128xbf16, #tpu.memory_space<vmem>>, vector<1x128x128xbf16>
    %11 = vector.shape_cast %10 : vector<1x128x128xbf16> to vector<128x128xbf16>
    %cst_9 = arith.constant dense<0.000000e+00> : vector<8x128xf32>
    %12 = tpu.matmul %9, %11, %cst_9 {dimension_numbers = #tpu.dot_dimension_numbers<[1], [0], [0], [1], [0, 0, 1, 1], [], []>} : vector<8x128xbf16>, vector<128x128xbf16>, vector<8x128xf32> -> vector<8x128xf32>
    %c0_10 = arith.constant 0 : index
    %c0_11 = arith.constant 0 : index
    %c0_12 = arith.constant 0 : index
    %13 = vector.load %arg5[%c0_10, %c0_11, %c0_12] : memref<1x1x128xf32, #tpu.memory_space<vmem>>, vector<1x1x128xf32>
    %14 = vector.shape_cast %13 : vector<1x1x128xf32> to vector<1x128xf32>
    %15 = vector.broadcast %14 : vector<1x128xf32> to vector<8x128xf32>
    %16 = arith.addf %12, %15 : vector<8x128xf32>
    %cst_13 = arith.constant 0.000000e+00 : f32
    %17 = vector.broadcast %cst_13 : f32 to vector<8x128xf32>
    %18 = arith.maximumf %16, %17 : vector<8x128xf32>
    %19 = arith.truncf %18 : vector<8x128xf32> to vector<8x128xbf16>
    %c0_14 = arith.constant 0 : index
    %c0_15 = arith.constant 0 : index
    %20 = vector.load %arg6[%c0_14, %c0_15] : memref<128x128xbf16, #tpu.memory_space<vmem>>, vector<128x128xbf16>
    %cst_16 = arith.constant dense<0.000000e+00> : vector<8x128xf32>
    %21 = tpu.matmul %19, %20, %cst_16 {dimension_numbers = #tpu.dot_dimension_numbers<[1], [0], [0], [1], [0, 0, 1, 1], [], []>} : vector<8x128xbf16>, vector<128x128xbf16>, vector<8x128xf32> -> vector<8x128xf32>
    %c0_17 = arith.constant 0 : index
    %c0_18 = arith.constant 0 : index
    %22 = vector.load %arg7[%c0_17, %c0_18] : memref<1x128xf32, #tpu.memory_space<vmem>>, vector<1x128xf32>
    %23 = vector.broadcast %22 : vector<1x128xf32> to vector<8x128xf32>
    %24 = arith.addf %21, %23 : vector<8x128xf32>
    %25 = tpu.iota {dimensions = array<i32: 1>} : vector<8x128xi32>
    %c4_i32 = arith.constant 4 : i32
    %26 = vector.broadcast %c4_i32 : i32 to vector<8x128xi32>
    %27 = arith.cmpi slt, %25, %26 : vector<8x128xi32>
    %cst_19 = arith.constant -1.000000e+30 : f32
    %28 = vector.broadcast %cst_19 : f32 to vector<8x128xf32>
    %29 = arith.select %27, %24, %28 : vector<8x128xi1>, vector<8x128xf32>
    %cst_20 = arith.constant dense<0xFF800000> : vector<8xf32>
    %30 = vector.multi_reduction <maximumf>, %29, %cst_20 [1] : vector<8x128xf32> to vector<8xf32>
    %31 = vector.shape_cast %30 : vector<8xf32> to vector<8x1xf32>
    %32 = vector.broadcast %31 : vector<8x1xf32> to vector<8x128xf32>
    %33 = arith.subf %29, %32 : vector<8x128xf32>
    %34 = math.exp %33 : vector<8x128xf32>
    %cst_21 = arith.constant dense<0.000000e+00> : vector<8xf32>
    %35 = vector.multi_reduction <add>, %34, %cst_21 [1] : vector<8x128xf32> to vector<8xf32>
    %36 = vector.shape_cast %35 : vector<8xf32> to vector<8x1xf32>
    %37 = tpu.reciprocal %36 {approx = true} : vector<8x1xf32> -> vector<8x1xf32>
    %38 = arith.mulf %36, %37 : vector<8x1xf32>
    %cst_22 = arith.constant 2.000000e+00 : f32
    %39 = vector.broadcast %cst_22 : f32 to vector<8x1xf32>
    %40 = arith.subf %39, %38 : vector<8x1xf32>
    %41 = arith.mulf %37, %40 : vector<8x1xf32>
    %42 = vector.broadcast %41 : vector<8x1xf32> to vector<8x128xf32>
    %43 = arith.mulf %34, %42 : vector<8x128xf32>
    %c0_23 = arith.constant 0 : index
    %c0_24 = arith.constant 0 : index
    %44 = vector.load %arg8[%c0_23, %c0_24] : memref<8x128xf32, #tpu.memory_space<vmem>>, vector<8x128xf32>
    tpu.vector_store %arg8[%c0_23, %c0_24], %43 {strides = array<i32>} : memref<8x128xf32, #tpu.memory_space<vmem>>, vector<8x128xf32>,
    return
  }
  func.func @transform_0(%arg0: i32) -> (i32, i32) {
    %c0_i32 = arith.constant 0 : i32
    %c0_i32_0 = arith.constant 0 : i32
    return %arg0, %c0_i32 : i32, i32
  }
  func.func @transform_1(%arg0: i32) -> (i32, i32) {
    %c0_i32 = arith.constant 0 : i32
    %c0_i32_0 = arith.constant 0 : i32
    %c0_i32_1 = arith.constant 0 : i32
    return %c0_i32, %c0_i32_0 : i32, i32
  }
  func.func @transform_2(%arg0: i32) -> (i32, i32) {
    %c0_i32 = arith.constant 0 : i32
    %c0_i32_0 = arith.constant 0 : i32
    %c0_i32_1 = arith.constant 0 : i32
    return %c0_i32, %c0_i32_0 : i32, i32
  }
  func.func @transform_3(%arg0: i32) -> (i32, i32, i32) {
    %c0_i32 = arith.constant 0 : i32
    %c0_i32_0 = arith.constant 0 : i32
    %c0_i32_1 = arith.constant 0 : i32
    %c0_i32_2 = arith.constant 0 : i32
    return %c0_i32, %c0_i32_0, %c0_i32_1 : i32, i32, i32
  }
  func.func @transform_4(%arg0: i32) -> (i32, i32, i32) {
    %c0_i32 = arith.constant 0 : i32
    %c0_i32_0 = arith.constant 0 : i32
    %c0_i32_1 = arith.constant 0 : i32
    %c0_i32_2 = arith.constant 0 : i32
    return %c0_i32, %c0_i32_0, %c0_i32_1 : i32, i32, i32
  }
  func.func @transform_5(%arg0: i32) -> (i32, i32) {
    %c0_i32 = arith.constant 0 : i32
    %c0_i32_0 = arith.constant 0 : i32
    %c0_i32_1 = arith.constant 0 : i32
    return %c0_i32, %c0_i32_0 : i32, i32
  }
  func.func @transform_6(%arg0: i32) -> (i32, i32) {
    %c0_i32 = arith.constant 0 : i32
    %c0_i32_0 = arith.constant 0 : i32
    %c0_i32_1 = arith.constant 0 : i32
    return %c0_i32, %c0_i32_0 : i32, i32
  }
  func.func @transform_7(%arg0: i32) -> (i32, i32) {
    %c0_i32 = arith.constant 0 : i32
    %c0_i32_0 = arith.constant 0 : i32
    return %arg0, %c0_i32 : i32, i32
  }
}

</mosaic_0001>

<bundles_post_ra>
// kernel: _forward_impl.1
= control target key start
LH: loop header
LB: loop body
LE: loop exit
PB: predicated region body
PF: predicated region fallthrough
CT: control target
= control target key end

     0   :  { %12 = vsyncpa [#allocation3], 0  ;;  %s793_s0 = inlined_call_operand.vmem [shape: f32[8,128], index: 0, kind: input, shape index: {}]   ;;  %s794_s1 = inlined_call_operand.hbm [shape: bf16[128,128], index: 1, kind: input, shape index: {}]   ;;  %s795_s2 = inlined_call_operand.vmem [shape: f32[1,128], index: 2, kind: input, shape index: {}]   ;;  %s796_s3 = inlined_call_operand.hbm [shape: bf16[1,128,128], index: 3, kind: input, shape index: {}]   ;;  %s797_s4 = inlined_call_operand.vmem [shape: f32[1,1,128], index: 4, kind: input, shape index: {}]   ;;  %s798_s5 = inlined_call_operand.hbm [shape: bf16[128,128], index: 5, kind: input, shape index: {}]   ;;  %s799_s6 = inlined_call_operand.vmem [shape: f32[1,128], index: 6, kind: input, shape index: {}]   ;;  %s800_s7 = inlined_call_operand.vmem [shape: f32[8,128], index: 7, kind: output, shape index: {}]  }
   0x1   :  { %13 = vsyncpa [#allocation5], 0  ;;  %s649_s24 = smov [#allocation4]   ;;  %s650_s26 = smov [#allocation2]  }
   0x2   :  { %s35_s25 = sshll.u32 %s649_s24, 4  ;;  %s21_s27 = sshll.u32 %s650_s26, 4  ;;  %s36_s25 = int_to_ptr.vmem [resolvable:$true] %s35_s25  ;;  %s696_s27 = int_to_ptr.vmem [resolvable:$true] %s21_s27 }
   0x3   :  { %s579_s30 = scalar_lea.hbm %s796_s3, 1024 }
   0x4   :  { %p580_p0 = scmp.ne.s32.totalorder %s796_s3, %s579_s30  ;;  %p583_p1 = scmp.lt.u32.totalorder %s579_s30, %s796_s3 }
   0x6   :  { %p585_p2 = pnand %p583_p1, %p580_p0 }
   0x8   :  { %588 = shalt.err (!%p585_p2)
}
   0x9   :  { %s589_s12 = scalar_lea.vmem %s36_s25, 1024  ;;  %p594_p4 = scmp.lt.s32.totalorder %s36_s25, %s36_s25 }
   0xa   :  { %p590_p3 = scmp.ne.s32.totalorder %s36_s25, %s589_s12  ;;  %p595_p5 = scmp.lt.s32.totalorder %s589_s12, %s589_s12 }
   0xc   :  { %p596_p6 = por %p595_p5, %p594_p4 }
   0xe   :  { %p597_p7 = pnand %p596_p6, %p590_p3 }
  0x10   :  { %600 = shalt.err (!%p597_p7)
}
  0x11   :  { %s651_s13 = smov 64   ;;  %s652_s14 = smov 4  }
  0x12   :  { %41 = dma.hbm_to_vmem [thread:$0]  %s796_s3, 1024, %s36_s25, [#allocation5], %s651_s13, %s651_s13, %s652_s14  }
  0x13   :  { %s601_s19 = scalar_lea.hbm %s794_s1, 1024 }
  0x14   :  { %p602_p8 = scmp.ne.s32.totalorder %s794_s1, %s601_s19  ;;  %p605_p9 = scmp.lt.u32.totalorder %s601_s19, %s794_s1 }
  0x16   :  { %p607_p10 = pnand %p605_p9, %p602_p8 }
  0x18   :  { %610 = shalt.err (!%p607_p10)
}
  0x19   :  { %s611_s24 = scalar_lea.vmem %s696_s27, 1024  ;;  %p616_p12 = scmp.lt.s32.totalorder %s696_s27, %s696_s27 }
  0x1a   :  { %p612_p11 = scmp.ne.s32.totalorder %s696_s27, %s611_s24  ;;  %p617_p13 = scmp.lt.s32.totalorder %s611_s24, %s611_s24 }
  0x1c   :  { %p618_p0 = por %p617_p13, %p616_p12 }
  0x1e   :  { %p619_p1 = pnand %p618_p0, %p612_p11 }
  0x20   :  { %622 = shalt.err (!%p619_p1)
}
  0x21   :  { %27 = dma.hbm_to_vmem [thread:$0]  %s794_s1, 1024, %s696_s27, [#allocation3], %s651_s13, %s651_s13, %s652_s14  }
  0x22   :  { %s653_s26 = smov [#allocation6]   ;;  %s623_s8 = scalar_lea.hbm %s798_s5, 1024 }
  0x23   :  { %s49_s28 = sshll.u32 %s653_s26, 4  ;;  %p624_p2 = scmp.ne.s32.totalorder %s798_s5, %s623_s8  ;;  %s50_s28 = int_to_ptr.vmem [resolvable:$true] %s49_s28 }
  0x24   :  { %p627_p3 = scmp.lt.u32.totalorder %s623_s8, %s798_s5 }
  0x26   :  { %p629_p4 = pnand %p627_p3, %p624_p2 }
  0x28   :  { %632 = shalt.err (!%p629_p4)
}
  0x29   :  { %s633_s15 = scalar_lea.vmem %s50_s28, 1024  ;;  %p638_p6 = scmp.lt.s32.totalorder %s50_s28, %s50_s28 }
  0x2a   :  { %p634_p5 = scmp.ne.s32.totalorder %s50_s28, %s633_s15  ;;  %p639_p7 = scmp.lt.s32.totalorder %s633_s15, %s633_s15 }
  0x2c   :  { %p640_p8 = por %p639_p7, %p638_p6 }
  0x2e   :  { %p641_p9 = pnand %p640_p8, %p634_p5 }
  0x30   :  { %644 = shalt.err (!%p641_p9)
}
  0x31   :  { %55 = dma.hbm_to_vmem [thread:$0]  %s798_s5, 1024, %s50_s28, [#allocation5], %s651_s13, %s651_s13, %s652_s14  }
  0x32   :  { %645 = dma.done.wait [#allocation3], 1024  }
  0x33   :  { %646 = vsyncadd [#allocation3], 4294966272 }
  0x34   :  { %647 = dma.done.wait [#allocation5], 2048  }
  0x35   :  { %648 = vsyncadd [#allocation5], 4294965248  ;;  %v654_v0 = vmov 0.0   ;;  %vm655_vm0 = vmmov 0   ;;  %v551_v1 = vld [vmem:[#allocation2] sm:$0xff]   ;;  %v552_v2 = vld [vmem:[#allocation2 + $0x8] sm:$0xff]   ;;  %v407_v43 = vlaneseq }
  0x36   :  { %484 = vmatprep.subr.bf16.mxu0 %v654_v0  ;;  %500 = vmatprep.mubr.msk.bf16.mxu0 %vm655_vm0, %v654_v0  ;;  %v553_v3 = vld [vmem:[#allocation2 + $0x10] sm:$0xff]   ;;  %v559_v4 = vld [vmem:[#allocation4] sm:$0xff]   ;;  %v554_v5 = vld [vmem:[#allocation2 + $0x18] sm:$0xff]  }
  0x37   :  { %504 = vmatprep.subr.bf16.mxu1 %v654_v0  ;;  %520 = vmatprep.mubr.msk.bf16.mxu1 %vm655_vm0, %v654_v0  ;;  %v560_v6 = vld [vmem:[#allocation4 + $0x8] sm:$0xff]   ;;  %v555_v7 = vld [vmem:[#allocation2 + $0x20] sm:$0xff]   ;;  %v561_v8 = vld [vmem:[#allocation4 + $0x10] sm:$0xff]   ;;  %v408_v44 = vand.u32 127, %v407_v43 }
  0x38   :  { %485 = vmatpush3.bf16.msra.mxu0 %v551_v1  ;;  %505 = vmatpush3.bf16.msra.mxu1 %v559_v4  ;;  %v556_v9 = vld [vmem:[#allocation2 + $0x28] sm:$0xff]   ;;  %v562_v10 = vld [vmem:[#allocation4 + $0x18] sm:$0xff]   ;;  %v557_v11 = vld [vmem:[#allocation2 + $0x30] sm:$0xff]  }
  0x39   :  { %486 = vmatprep.subr.bf16.mxu0 %v654_v0  ;;  %506 = vmatprep.subr.bf16.mxu1 %v654_v0  ;;  %v563_v12 = vld [vmem:[#allocation4 + $0x20] sm:$0xff]   ;;  %v558_v13 = vld [vmem:[#allocation2 + $0x38] sm:$0xff]   ;;  %v564_v15 = vld [vmem:[#allocation4 + $0x28] sm:$0xff]   ;;  %vm409_vm1 = vcmp.lt.s32.totalorder %v408_v44, 4 }
  0x3a   :  { %v68_v14 = vld [vmem:[%s793_s0] sm:$0xff]  ;;  %v565_v17 = vld [vmem:[#allocation4 + $0x30] sm:$0xff]   ;;  %v566_v18 = vld [vmem:[#allocation4 + $0x38] sm:$0xff]  }
  0x3b   :  { %v69_v16 = vpack.c.bf16 %v68_v14, %v68_v14  ;;  %v567_v19 = vld [vmem:[#allocation6] sm:$0xff]   ;;  %v568_v20 = vld [vmem:[#allocation6 + $0x8] sm:$0xff]   ;;  %v569_v21 = vld [vmem:[#allocation6 + $0x10] sm:$0xff]  }
  0x3c   :  { %487 = vmatpush3.bf16.msra.mxu0 %v552_v2  ;;  %507 = vmatpush3.bf16.msra.mxu1 %v560_v6  ;;  %v570_v22 = vld [vmem:[#allocation6 + $0x18] sm:$0xff]   ;;  %v571_v23 = vld [vmem:[#allocation6 + $0x20] sm:$0xff]   ;;  %v572_v24 = vld [vmem:[#allocation6 + $0x28] sm:$0xff]  }
  0x3d   :  { %488 = vmatprep.subr.bf16.mxu0 %v654_v0  ;;  %508 = vmatprep.subr.bf16.mxu1 %v654_v0  ;;  %v430_v25 = vld [vmem:[%s795_s2] ss:$0 sm:$0xff]  ;;  %v573_v33 = vld [vmem:[#allocation6 + $0x30] sm:$0xff]   ;;  %v574_v34 = vld [vmem:[#allocation6 + $0x38] sm:$0xff]  }
  0x3e   :  { %v439_v35 = vld [vmem:[%s797_s4] ss:$0 sm:$0xff] }
  0x3f   :  { %v448_v45 = vld [vmem:[%s799_s6] ss:$0 sm:$0xff] }
  0x40   :  { %489 = vmatpush3.bf16.msra.mxu0 %v553_v3  ;;  %509 = vmatpush3.bf16.msra.mxu1 %v561_v8 }
  0x41   :  { %490 = vmatprep.subr.bf16.mxu0 %v654_v0  ;;  %510 = vmatprep.subr.bf16.mxu1 %v654_v0 }
  0x44   :  { %491 = vmatpush3.bf16.msra.mxu0 %v554_v5  ;;  %511 = vmatpush3.bf16.msra.mxu1 %v562_v10 }
  0x45   :  { %492 = vmatprep.subr.bf16.mxu0 %v654_v0  ;;  %512 = vmatprep.subr.bf16.mxu1 %v654_v0 }
  0x48   :  { %493 = vmatpush3.bf16.msra.mxu0 %v555_v7  ;;  %513 = vmatpush3.bf16.msra.mxu1 %v563_v12 }
  0x49   :  { %494 = vmatprep.subr.bf16.mxu0 %v654_v0  ;;  %514 = vmatprep.subr.bf16.mxu1 %v654_v0 }
  0x4c   :  { %495 = vmatpush3.bf16.msra.mxu0 %v556_v9  ;;  %515 = vmatpush3.bf16.msra.mxu1 %v564_v15 }
  0x4d   :  { %496 = vmatprep.subr.bf16.mxu0 %v654_v0  ;;  %516 = vmatprep.subr.bf16.mxu1 %v654_v0 }
  0x50   :  { %497 = vmatpush3.bf16.msra.mxu0 %v557_v11  ;;  %517 = vmatpush3.bf16.msra.mxu1 %v565_v17 }
  0x51   :  { %498 = vmatprep.subr.bf16.mxu0 %v654_v0  ;;  %518 = vmatprep.subr.bf16.mxu1 %v654_v0 }
  0x54   :  { %499 = vmatpush3.bf16.msra.mxu0 %v558_v13  ;;  %519 = vmatpush3.bf16.msra.mxu1 %v566_v18 }
  0x55   :  { %524 = vmatprep.subr.bf16.mxu0 %v654_v0 }
  0x57   :  { %501 = vmatmul.mubr.bf16.vlgmr.msra.gmra.mrb[0].mxu0 %v69_v16 }
  0x58   :  { %540 = vmatprep.mubr.msk.bf16.mxu0 %vm655_vm0, %v654_v0  ;;  %525 = vmatpush3.bf16.msra.mxu0 %v567_v19 }
  0x59   :  { %526 = vmatprep.subr.bf16.mxu0 %v654_v0 }
  0x5c   :  { %527 = vmatpush3.bf16.msra.mxu0 %v568_v20 }
  0x5d   :  { %528 = vmatprep.subr.bf16.mxu0 %v654_v0 }
  0x60   :  { %529 = vmatpush3.bf16.msra.mxu0 %v569_v21 }
  0x61   :  { %530 = vmatprep.subr.bf16.mxu0 %v654_v0 }
  0x64   :  { %531 = vmatpush3.bf16.msra.mxu0 %v570_v22 }
  0x65   :  { %532 = vmatprep.subr.bf16.mxu0 %v654_v0 }
  0x68   :  { %533 = vmatpush3.bf16.msra.mxu0 %v571_v23 }
  0x69   :  { %534 = vmatprep.subr.bf16.mxu0 %v654_v0 }
  0x6c   :  { %535 = vmatpush3.bf16.msra.mxu0 %v572_v24 }
  0x6d   :  { %536 = vmatprep.subr.bf16.mxu0 %v654_v0 }
  0x70   :  { %537 = vmatpush3.bf16.msra.mxu0 %v573_v33 }
  0x71   :  { %538 = vmatprep.subr.bf16.mxu0 %v654_v0 }
  0x74   :  { %539 = vmatpush3.bf16.msra.mxu0 %v574_v34 }
 0x12a   :  { %v175_v26 = vpop.f32.mrb[0].mxu0 }
 0x12b   :  { %v176_v27 = vadd.f32 %v430_v25, %v175_v26  ;;  %v502_v28 = vpop.f32.mrb[1].mxu0 }
 0x12c   :  { %v178_v29 = vpop.f32.mrb[2].mxu0 }
 0x12d   :  { %v181_v30 = vmax.f32 %v176_v27, 0.0  ;;  %v503_v31 = vpop.f32.mrb[3].mxu0 }
 0x12f   :  { %v182_v32 = vpack.c.bf16 %v181_v30, %v181_v30 }
 0x131   :  { %521 = vmatmul.mubr.bf16.vlgmr.msra.gmra.mrb[0].mxu1 %v182_v32 }
 0x204   :  { %v288_v36 = vpop.f32.mrb[0].mxu1 }
 0x205   :  { %v289_v37 = vadd.f32 %v439_v35, %v288_v36  ;;  %v522_v38 = vpop.f32.mrb[1].mxu1 }
 0x206   :  { %v291_v39 = vpop.f32.mrb[2].mxu1 }
 0x207   :  { %v294_v40 = vmax.f32 %v289_v37, 0.0  ;;  %v523_v41 = vpop.f32.mrb[3].mxu1 }
 0x209   :  { %v295_v42 = vpack.c.bf16 %v294_v40, %v294_v40 }
 0x20b   :  { %541 = vmatmul.mubr.bf16.vlgmr.msra.gmra.mrb[4].mxu0 %v295_v42 }
 0x2de   :  { %v401_v46 = vpop.f32.mrb[4].mxu0 }
 0x2df   :  { %v402_v47 = vadd.f32 %v448_v45, %v401_v46  ;;  %v542_v48 = vpop.f32.mrb[5].mxu0 }
 0x2e0   :  { %v404_v49 = vpop.f32.mrb[6].mxu0 }
 0x2e1   :  { %v543_v50 = vpop.f32.mrb[7].mxu0  ;;  %v410_v51 = vsel %vm409_vm1, %v402_v47, -1e+30 }
 0x2e2   :  { %411 = vmax.xlane.f32.xlu0 %v410_v51 }
 0x36f   :  { %v412_v52 = vpop.xlane.xlu0 %411 }
 0x370   :  { %v413_v53 = vsub.f32 %v410_v51, %v412_v52 }
 0x372   :  { %v414_v54 = vmul.f32 1.442695, %v413_v53 }
 0x374   :  { %575 = vpow2.f32 %v414_v54 }
 0x37e   :  { %v576_v55 = vpop.eup %575 }
 0x37f   :  { %416 = vadd.xlane.f32.xlu0 %v576_v55 }
 0x40c   :  { %v417_v56 = vpop.xlane.xlu0 %416 }
 0x40d   :  { %577 = vrcp.f32 %v417_v56 }
 0x417   :  { %v578_v57 = vpop.eup %577 }
 0x418   :  { %v419_v58 = vmul.f32 %v578_v57, %v417_v56 }
 0x41a   :  { %v420_v59 = vsub.f32 2.0, %v419_v58 }
 0x41c   :  { %v421_v60 = vmul.f32 %v578_v57, %v420_v59 }
 0x41e   :  { %v422_v61 = vmul.f32 %v576_v55, %v421_v60 }
 0x420   :  { %423 = vst [vmem:[%s800_s7] sm:$0xff] %v422_v61 }
 0x421   :  { %428 = vsyncpa [#allocation3], 1 }
 0x422   :  { %429 = vsyncpa [#allocation5], 1 }

// kernel: _forward_impl.1
= control target key start
LH: loop header
LB: loop body
LE: loop exit
PB: predicated region body
PF: predicated region fallthrough
CT: control target
= control target key end

     0   :  { %12 = vsyncpa [#allocation3], 0  ;;  %s793_s0 = inlined_call_operand.vmem [shape: f32[8,128], index: 0, kind: input, shape index: {}]   ;;  %s794_s1 = inlined_call_operand.hbm [shape: bf16[128,128], index: 1, kind: input, shape index: {}]   ;;  %s795_s2 = inlined_call_operand.vmem [shape: f32[1,128], index: 2, kind: input, shape index: {}]   ;;  %s796_s3 = inlined_call_operand.hbm [shape: bf16[1,128,128], index: 3, kind: input, shape index: {}]   ;;  %s797_s4 = inlined_call_operand.vmem [shape: f32[1,1,128], index: 4, kind: input, shape index: {}]   ;;  %s798_s5 = inlined_call_operand.hbm [shape: bf16[128,128], index: 5, kind: input, shape index: {}]   ;;  %s799_s6 = inlined_call_operand.vmem [shape: f32[1,128], index: 6, kind: input, shape index: {}]   ;;  %s800_s7 = inlined_call_operand.vmem [shape: f32[8,128], index: 7, kind: output, shape index: {}]  }
   0x1   :  { %13 = vsyncpa [#allocation5], 0  ;;  %s649_s24 = smov [#allocation4]   ;;  %s650_s26 = smov [#allocation2]  }
   0x2   :  { %s35_s25 = sshll.u32 %s649_s24, 4  ;;  %s21_s27 = sshll.u32 %s650_s26, 4  ;;  %s36_s25 = int_to_ptr.vmem [resolvable:$true] %s35_s25  ;;  %s696_s27 = int_to_ptr.vmem [resolvable:$true] %s21_s27 }
   0x3   :  { %s579_s30 = scalar_lea.hbm %s796_s3, 1024 }
   0x4   :  { %p580_p0 = scmp.ne.s32.totalorder %s796_s3, %s579_s30  ;;  %p583_p1 = scmp.lt.u32.totalorder %s579_s30, %s796_s3 }
   0x6   :  { %p585_p2 = pnand %p583_p1, %p580_p0 }
   0x8   :  { %588 = shalt.err (!%p585_p2)
}
   0x9   :  { %s589_s12 = scalar_lea.vmem %s36_s25, 1024  ;;  %p594_p4 = scmp.lt.s32.totalorder %s36_s25, %s36_s25 }
   0xa   :  { %p590_p3 = scmp.ne.s32.totalorder %s36_s25, %s589_s12  ;;  %p595_p5 = scmp.lt.s32.totalorder %s589_s12, %s589_s12 }
   0xc   :  { %p596_p6 = por %p595_p5, %p594_p4 }
   0xe   :  { %p597_p7 = pnand %p596_p6, %p590_p3 }
  0x10   :  { %600 = shalt.err (!%p597_p7)
}
  0x11   :  { %s651_s13 = smov 64   ;;  %s652_s14 = smov 4  }
  0x12   :  { %41 = dma.hbm_to_vmem [thread:$0]  %s796_s3, 1024, %s36_s25, [#allocation5], %s651_s13, %s651_s13, %s652_s14  }
  0x13   :  { %s601_s19 = scalar_lea.hbm %s794_s1, 1024 }
  0x14   :  { %p602_p8 = scmp.ne.s32.totalorder %s794_s1, %s601_s19  ;;  %p605_p9 = scmp.lt.u32.totalorder %s601_s19, %s794_s1 }
  0x16   :  { %p607_p10 = pnand %p605_p9, %p602_p8 }
  0x18   :  { %610 = shalt.err (!%p607_p10)
}
  0x19   :  { %s611_s24 = scalar_lea.vmem %s696_s27, 1024  ;;  %p616_p12 = scmp.lt.s32.totalorder %s696_s27, %s696_s27 }
  0x1a   :  { %p612_p11 = scmp.ne.s32.totalorder %s696_s27, %s611_s24  ;;  %p617_p13 = scmp.lt.s32.totalorder %s611_s24, %s611_s24 }
  0x1c   :  { %p618_p0 = por %p617_p13, %p616_p12 }
  0x1e   :  { %p619_p1 = pnand %p618_p0, %p612_p11 }
  0x20   :  { %622 = shalt.err (!%p619_p1)
}
  0x21   :  { %27 = dma.hbm_to_vmem [thread:$0]  %s794_s1, 1024, %s696_s27, [#allocation3], %s651_s13, %s651_s13, %s652_s14  }
  0x22   :  { %s653_s26 = smov [#allocation6]   ;;  %s623_s8 = scalar_lea.hbm %s798_s5, 1024 }
  0x23   :  { %s49_s28 = sshll.u32 %s653_s26, 4  ;;  %p624_p2 = scmp.ne.s32.totalorder %s798_s5, %s623_s8  ;;  %s50_s28 = int_to_ptr.vmem [resolvable:$true] %s49_s28 }
  0x24   :  { %p627_p3 = scmp.lt.u32.totalorder %s623_s8, %s798_s5 }
  0x26   :  { %p629_p4 = pnand %p627_p3, %p624_p2 }
  0x28   :  { %632 = shalt.err (!%p629_p4)
}
  0x29   :  { %s633_s15 = scalar_lea.vmem %s50_s28, 1024  ;;  %p638_p6 = scmp.lt.s32.totalorder %s50_s28, %s50_s28 }
  0x2a   :  { %p634_p5 = scmp.ne.s32.totalorder %s50_s28, %s633_s15  ;;  %p639_p7 = scmp.lt.s32.totalorder %s633_s15, %s633_s15 }
  0x2c   :  { %p640_p8 = por %p639_p7, %p638_p6 }
  0x2e   :  { %p641_p9 = pnand %p640_p8, %p634_p5 }
  0x30   :  { %644 = shalt.err (!%p641_p9)
}
  0x31   :  { %55 = dma.hbm_to_vmem [thread:$0]  %s798_s5, 1024, %s50_s28, [#allocation5], %s651_s13, %s651_s13, %s652_s14  }
  0x32   :  { %645 = dma.done.wait [#allocation3], 1024  }
  0x33   :  { %646 = vsyncadd [#allocation3], 4294966272 }
  0x34   :  { %647 = dma.done.wait [#allocation5], 2048  }
  0x35   :  { %648 = vsyncadd [#allocation5], 4294965248  ;;  %v654_v0 = vmov 0.0   ;;  %vm655_vm0 = vmmov 0   ;;  %v551_v1 = vld [vmem:[#allocation2] sm:$0xff]   ;;  %v552_v2 = vld [vmem:[#allocation2 + $0x8] sm:$0xff]   ;;  %v407_v43 = vlaneseq }
  0x36   :  { %484 = vmatprep.subr.bf16.mxu0 %v654_v0  ;;  %500 = vmatprep.mubr.msk.bf16.mxu0 %vm655_vm0, %v654_v0  ;;  %v553_v3 = vld [vmem:[#allocation2 + $0x10] sm:$0xff]   ;;  %v559_v4 = vld [vmem:[#allocation4] sm:$0xff]   ;;  %v554_v5 = vld [vmem:[#allocation2 + $0x18] sm:$0xff]  }
  0x37   :  { %504 = vmatprep.subr.bf16.mxu1 %v654_v0  ;;  %520 = vmatprep.mubr.msk.bf16.mxu1 %vm655_vm0, %v654_v0  ;;  %v560_v6 = vld [vmem:[#allocation4 + $0x8] sm:$0xff]   ;;  %v555_v7 = vld [vmem:[#allocation2 + $0x20] sm:$0xff]   ;;  %v561_v8 = vld [vmem:[#allocation4 + $0x10] sm:$0xff]   ;;  %v408_v44 = vand.u32 127, %v407_v43 }
  0x38   :  { %485 = vmatpush3.bf16.msra.mxu0 %v551_v1  ;;  %505 = vmatpush3.bf16.msra.mxu1 %v559_v4  ;;  %v556_v9 = vld [vmem:[#allocation2 + $0x28] sm:$0xff]   ;;  %v562_v10 = vld [vmem:[#allocation4 + $0x18] sm:$0xff]   ;;  %v557_v11 = vld [vmem:[#allocation2 + $0x30] sm:$0xff]  }
  0x39   :  { %486 = vmatprep.subr.bf16.mxu0 %v654_v0  ;;  %506 = vmatprep.subr.bf16.mxu1 %v654_v0  ;;  %v563_v12 = vld [vmem:[#allocation4 + $0x20] sm:$0xff]   ;;  %v558_v13 = vld [vmem:[#allocation2 + $0x38] sm:$0xff]   ;;  %v564_v15 = vld [vmem:[#allocation4 + $0x28] sm:$0xff]   ;;  %vm409_vm1 = vcmp.lt.s32.totalorder %v408_v44, 4 }
  0x3a   :  { %v68_v14 = vld [vmem:[%s793_s0] sm:$0xff]  ;;  %v565_v17 = vld [vmem:[#allocation4 + $0x30] sm:$0xff]   ;;  %v566_v18 = vld [vmem:[#allocation4 + $0x38] sm:$0xff]  }
  0x3b   :  { %v69_v16 = vpack.c.bf16 %v68_v14, %v68_v14  ;;  %v567_v19 = vld [vmem:[#allocation6] sm:$0xff]   ;;  %v568_v20 = vld [vmem:[#allocation6 + $0x8] sm:$0xff]   ;;  %v569_v21 = vld [vmem:[#allocation6 + $0x10] sm:$0xff]  }
  0x3c   :  { %487 = vmatpush3.bf16.msra.mxu0 %v552_v2  ;;  %507 = vmatpush3.bf16.msra.mxu1 %v560_v6  ;;  %v570_v22 = vld [vmem:[#allocation6 + $0x18] sm:$0xff]   ;;  %v571_v23 = vld [vmem:[#allocation6 + $0x20] sm:$0xff]   ;;  %v572_v24 = vld [vmem:[#allocation6 + $0x28] sm:$0xff]  }
  0x3d   :  { %488 = vmatprep.subr.bf16.mxu0 %v654_v0  ;;  %508 = vmatprep.subr.bf16.mxu1 %v654_v0  ;;  %v430_v25 = vld [vmem:[%s795_s2] ss:$0 sm:$0xff]  ;;  %v573_v33 = vld [vmem:[#allocation6 + $0x30] sm:$0xff]   ;;  %v574_v34 = vld [vmem:[#allocation6 + $0x38] sm:$0xff]  }
  0x3e   :  { %v439_v35 = vld [vmem:[%s797_s4] ss:$0 sm:$0xff] }
  0x3f   :  { %v448_v45 = vld [vmem:[%s799_s6] ss:$0 sm:$0xff] }
  0x40   :  { %489 = vmatpush3.bf16.msra.mxu0 %v553_v3  ;;  %509 = vmatpush3.bf16.msra.mxu1 %v561_v8 }
  0x41   :  { %490 = vmatprep.subr.bf16.mxu0 %v654_v0  ;;  %510 = vmatprep.subr.bf16.mxu1 %v654_v0 }
  0x44   :  { %491 = vmatpush3.bf16.msra.mxu0 %v554_v5  ;;  %511 = vmatpush3.bf16.msra.mxu1 %v562_v10 }
  0x45   :  { %492 = vmatprep.subr.bf16.mxu0 %v654_v0  ;;  %512 = vmatprep.subr.bf16.mxu1 %v654_v0 }
  0x48   :  { %493 = vmatpush3.bf16.msra.mxu0 %v555_v7  ;;  %513 = vmatpush3.bf16.msra.mxu1 %v563_v12 }
  0x49   :  { %494 = vmatprep.subr.bf16.mxu0 %v654_v0  ;;  %514 = vmatprep.subr.bf16.mxu1 %v654_v0 }
  0x4c   :  { %495 = vmatpush3.bf16.msra.mxu0 %v556_v9  ;;  %515 = vmatpush3.bf16.msra.mxu1 %v564_v15 }
  0x4d   :  { %496 = vmatprep.subr.bf16.mxu0 %v654_v0  ;;  %516 = vmatprep.subr.bf16.mxu1 %v654_v0 }
  0x50   :  { %497 = vmatpush3.bf16.msra.mxu0 %v557_v11  ;;  %517 = vmatpush3.bf16.msra.mxu1 %v565_v17 }
  0x51   :  { %498 = vmatprep.subr.bf16.mxu0 %v654_v0  ;;  %518 = vmatprep.subr.bf16.mxu1 %v654_v0 }
  0x54   :  { %499 = vmatpush3.bf16.msra.mxu0 %v558_v13  ;;  %519 = vmatpush3.bf16.msra.mxu1 %v566_v18 }
  0x55   :  { %524 = vmatprep.subr.bf16.mxu0 %v654_v0 }
  0x57   :  { %501 = vmatmul.mubr.bf16.vlgmr.msra.gmra.mrb[0].mxu0 %v69_v16 }
  0x58   :  { %540 = vmatprep.mubr.msk.bf16.mxu0 %vm655_vm0, %v654_v0  ;;  %525 = vmatpush3.bf16.msra.mxu0 %v567_v19 }
  0x59   :  { %526 = vmatprep.subr.bf16.mxu0 %v654_v0 }
  0x5c   :  { %527 = vmatpush3.bf16.msra.mxu0 %v568_v20 }
  0x5d   :  { %528 = vmatprep.subr.bf16.mxu0 %v654_v0 }
  0x60   :  { %529 = vmatpush3.bf16.msra.mxu0 %v569_v21 }
  0x61   :  { %530 = vmatprep.subr.bf16.mxu0 %v654_v0 }
  0x64   :  { %531 = vmatpush3.bf16.msra.mxu0 %v570_v22 }
  0x65   :  { %532 = vmatprep.subr.bf16.mxu0 %v654_v0 }
  0x68   :  { %533 = vmatpush3.bf16.msra.mxu0 %v571_v23 }
  0x69   :  { %534 = vmatprep.subr.bf16.mxu0 %v654_v0 }
  0x6c   :  { %535 = vmatpush3.bf16.msra.mxu0 %v572_v24 }
  0x6d   :  { %536 = vmatprep.subr.bf16.mxu0 %v654_v0 }
  0x70   :  { %537 = vmatpush3.bf16.msra.mxu0 %v573_v33 }
  0x71   :  { %538 = vmatprep.subr.bf16.mxu0 %v654_v0 }
  0x74   :  { %539 = vmatpush3.bf16.msra.mxu0 %v574_v34 }
 0x12a   :  { %v175_v26 = vpop.f32.mrb[0].mxu0 }
 0x12b   :  { %v176_v27 = vadd.f32 %v430_v25, %v175_v26  ;;  %v502_v28 = vpop.f32.mrb[1].mxu0 }
 0x12c   :  { %v178_v29 = vpop.f32.mrb[2].mxu0 }
 0x12d   :  { %v181_v30 = vmax.f32 %v176_v27, 0.0  ;;  %v503_v31 = vpop.f32.mrb[3].mxu0 }
 0x12f   :  { %v182_v32 = vpack.c.bf16 %v181_v30, %v181_v30 }
 0x131   :  { %521 = vmatmul.mubr.bf16.vlgmr.msra.gmra.mrb[0].mxu1 %v182_v32 }
 0x204   :  { %v288_v36 = vpop.f32.mrb[0].mxu1 }
 0x205   :  { %v289_v37 = vadd.f32 %v439_v35, %v288_v36  ;;  %v522_v38 = vpop.f32.mrb[1].mxu1 }
 0x206   :  { %v291_v39 = vpop.f32.mrb[2].mxu1 }
 0x207   :  { %v294_v40 = vmax.f32 %v289_v37, 0.0  ;;  %v523_v41 = vpop.f32.mrb[3].mxu1 }
 0x209   :  { %v295_v42 = vpack.c.bf16 %v294_v40, %v294_v40 }
 0x20b   :  { %541 = vmatmul.mubr.bf16.vlgmr.msra.gmra.mrb[4].mxu0 %v295_v42 }
 0x2de   :  { %v401_v46 = vpop.f32.mrb[4].mxu0 }
 0x2df   :  { %v402_v47 = vadd.f32 %v448_v45, %v401_v46  ;;  %v542_v48 = vpop.f32.mrb[5].mxu0 }
 0x2e0   :  { %v404_v49 = vpop.f32.mrb[6].mxu0 }
 0x2e1   :  { %v543_v50 = vpop.f32.mrb[7].mxu0  ;;  %v410_v51 = vsel %vm409_vm1, %v402_v47, -1e+30 }
 0x2e2   :  { %411 = vmax.xlane.f32.xlu0 %v410_v51 }
 0x36f   :  { %v412_v52 = vpop.xlane.xlu0 %411 }
 0x370   :  { %v413_v53 = vsub.f32 %v410_v51, %v412_v52 }
 0x372   :  { %v414_v54 = vmul.f32 1.442695, %v413_v53 }
 0x374   :  { %575 = vpow2.f32 %v414_v54 }
 0x37e   :  { %v576_v55 = vpop.eup %575 }
 0x37f   :  { %416 = vadd.xlane.f32.xlu0 %v576_v55 }
 0x40c   :  { %v417_v56 = vpop.xlane.xlu0 %416 }
 0x40d   :  { %577 = vrcp.f32 %v417_v56 }
 0x417   :  { %v578_v57 = vpop.eup %577 }
 0x418   :  { %v419_v58 = vmul.f32 %v578_v57, %v417_v56 }
 0x41a   :  { %v420_v59 = vsub.f32 2.0, %v419_v58 }
 0x41c   :  { %v421_v60 = vmul.f32 %v578_v57, %v420_v59 }
 0x41e   :  { %v422_v61 = vmul.f32 %v576_v55, %v421_v60 }
 0x420   :  { %423 = vst [vmem:[%s800_s7] sm:$0xff] %v422_v61 }
 0x421   :  { %428 = vsyncpa [#allocation3], 1 }
 0x422   :  { %429 = vsyncpa [#allocation5], 1 }

</bundles_post_ra>
